<compile_context>
chip_gen: v5e
topology: v5e:2x2
jax: 0.10.0
libtpu: 0.0.40
codegen_flags: <defaults>
</compile_context>

<pallas_src>
from functools import partial

import jax
import jax.numpy as jnp
from jax.experimental import pallas as pl
from jax.experimental.pallas import tpu as pltpu


_LANES = 128      # vreg lane width: dense output slab / wide parameter slab
_SEG = 16         # bf16 row-packing alignment for packed-slab segments
_NEG = -1e30      # baked into padded b3 lanes -> argmax/softmax-safe dense slab


def _round_up(n, m):
    return ((n + m - 1) // m) * m


def _narrow_offsets(fin_p):
    """Row offsets inside the narrow (hidden-lane) parameter slab.
    Single source of truth for pack_params() and the kernel."""
    return {
        "w1": 0,                  # [0, fin_p)            w1^T  (Fin_p x hidden)
        "b1": fin_p,              # row fin_p             b1
        "w2": fin_p + _SEG,       # [fin_p+16, +hidden)   w2^T  (hidden x hidden)
        "b2": fin_p + 2 * _SEG,   # row fin_p+32          b2
        "rows": fin_p + 3 * _SEG,
    }


# ----------------------------------------------------------------------------
# Kernel
# ----------------------------------------------------------------------------
def _mlp_kernel(x_ref, pn_ref, pw_ref, o_ref, *, fin_p):
    """x_ref:  [B, Fin_p]        f32 (cast to bf16 in-kernel for the MXU)
       pn_ref: [Fin_p+48, H]     bf16 narrow slab: w1^T | b1 | w2^T | b2
       pw_ref: [32, 128]         bf16 wide slab:   w3^T | b3 (pad lanes = -1e30)
       o_ref:  [B, 128]          f32 dense, lane-dense unmasked store
    """
    hidden = pn_ref.shape[1]
    off = _narrow_offsets(fin_p)

    x = x_ref[...].astype(jnp.bfloat16)

    # Layer 1: x @ w1^T + b1, ReLU.  Weight is a ref-slice -> streams from VMEM.
    # Bias adds are hoisted single broadcasts (no inner loop); if a future
    # in-kernel loop over rows is added, switch to pl.ds(off, B, stride=0) reads.
    h1 = jnp.dot(x, pn_ref[off["w1"]:off["w1"] + fin_p, :],
                 preferred_element_type=jnp.float32)
    h1 = h1 + pn_ref[off["b1"]:off["b1"] + 1, :].astype(jnp.float32)
    h1 = jnp.maximum(h1, 0.0)

    # Layer 2: hidden stays 8-lane narrow (hidden x hidden is tiny).
    h2 = jnp.dot(h1.astype(jnp.bfloat16),
                 pn_ref[off["w2"]:off["w2"] + hidden, :],
                 preferred_element_type=jnp.float32)
    h2 = h2 + pn_ref[off["b2"]:off["b2"] + 1, :].astype(jnp.float32)
    h2 = jnp.maximum(h2, 0.0)

    # Layer 3: go lane-dense (128-wide) for the unmasked output store.
    out = jnp.dot(h2.astype(jnp.bfloat16), pw_ref[0:hidden, :],
                  preferred_element_type=jnp.float32)
    out = out + pw_ref[_SEG:_SEG + 1, :].astype(jnp.float32)

    o_ref[...] = out.astype(o_ref.dtype)


# ----------------------------------------------------------------------------
# Parameter packing (one-time layout plumbing, outside the hot path)
# ----------------------------------------------------------------------------
def pack_params(params, input_size, output_size):
    """Pre-transpose, zero-pad, bf16-cast and concatenate the parameters into:
       pn: [Fin_p + 48, hidden] bf16  (w1^T | b1 | w2^T | b2, 16-row aligned)
       pw: [32, 128]            bf16  (w3^T | b3; b3 pad lanes = -1e30)
    """
    hidden = params["w1"].shape[0]
    assert params["w3"].shape == (output_size, hidden)
    assert output_size <= _LANES and hidden <= _LANES

    fin_p = _round_up(max(input_size, 1), _SEG)
    off = _narrow_offsets(fin_p)

    pn = jnp.zeros((off["rows"], hidden), jnp.float32)
    pn = pn.at[:input_size, :].set(params["w1"].T.astype(jnp.float32))
    pn = pn.at[off["b1"], :].set(params["b1"].astype(jnp.float32))
    pn = pn.at[off["w2"]:off["w2"] + hidden, :].set(params["w2"].T.astype(jnp.float32))
    pn = pn.at[off["b2"], :].set(params["b2"].astype(jnp.float32))

    pw = jnp.zeros((2 * _SEG, _LANES), jnp.float32)
    pw = pw.at[:hidden, :output_size].set(params["w3"].T.astype(jnp.float32))
    b3_row = jnp.full((_LANES,), _NEG, jnp.float32).at[:output_size].set(
        params["b3"].astype(jnp.float32))
    pw = pw.at[_SEG, :].set(b3_row)

    return pn.astype(jnp.bfloat16), pw.astype(jnp.bfloat16)


def packed_input_features(pn):
    """Padded input-feature count implied by the narrow slab."""
    return pn.shape[0] - 3 * _SEG


def pad_inputs(x, fin_p, row_multiple=8):
    """Pad x to [round_up(B, row_multiple), fin_p]. Do this ONCE upstream."""
    b, f = x.shape
    if f > fin_p:
        raise ValueError(f"x has {f} features, packed params expect <= {fin_p}")
    bp = _round_up(b, row_multiple)
    return jnp.pad(x, ((0, bp - b), (0, fin_p - f)))


# ----------------------------------------------------------------------------
# Forward passes
# ----------------------------------------------------------------------------
def neural_net_forward_padded(x_padded, pn, pw, *, block_b=None):
    """Hot path. x_padded: [Bp, Fin_p] f32 (pre-padded). Returns the dense
    [Bp, 128] f32 logit slab; columns >= output_size hold ~-1e30 (argmax-safe).
    block_b: optional batch-tile size (multiple of 8) -> parallel grid over B."""
    bp, fin_x = x_padded.shape
    fin_p = packed_input_features(pn)
    if fin_x != fin_p:
        raise ValueError(f"x has {fin_x} padded features, packed params expect {fin_p}")

    kernel = partial(_mlp_kernel, fin_p=fin_p)
    out_shape = jax.ShapeDtypeStruct((bp, _LANES), jnp.float32)

    if block_b is None or block_b >= bp:
        # Tiny batches: gridless, whole-array VMEM blocks, no pipeline bookkeeping.
        return pl.pallas_call(
            kernel,
            out_shape=out_shape,
            in_specs=[pl.BlockSpec(memory_space=pltpu.MemorySpace.VMEM)] * 3,
            out_specs=pl.BlockSpec(memory_space=pltpu.MemorySpace.VMEM),
        )(x_padded, pn, pw)

    if bp % block_b != 0 or block_b % 8 != 0:
        raise ValueError("block_b must be a multiple of 8 and divide the padded batch")

    # Large batches: parallel grid over row tiles (v7x: both TensorCores).
    # VMEM budget per step ~ 2 * block_b * (fin_p + 128) * 4B + params; keep it
    # well under the scoped limit (32 MiB default; v7x has 64 MiB physical vs.
    # 128 MiB on v5e/v6e) or raise vmem_limit_bytes explicitly.
    return pl.pallas_call(
        kernel,
        out_shape=out_shape,
        grid=(bp // block_b,),
        in_specs=[
            pl.BlockSpec((block_b, fin_p), lambda i: (i, 0)),
            pl.BlockSpec(pn.shape, lambda i: (0, 0)),   # params resident
            pl.BlockSpec(pw.shape, lambda i: (0, 0)),
        ],
        out_specs=pl.BlockSpec((block_b, _LANES), lambda i: (i, 0)),
        compiler_params=pltpu.CompilerParams(dimension_semantics=("parallel",)),
    )(x_padded, pn, pw)


def neural_net_forward(x, pn, pw, output_size, *, block_b=None):
    """Module-equivalent API: [B, input_size] f32 -> [B, output_size] f32 logits.
    Note: the pad/slice here are extra XLA ops; prefer pad_inputs() once upstream
    + neural_net_forward_padded(), consuming the dense slab directly."""
    fin_p = packed_input_features(pn)
    b = x.shape[0]
    out = neural_net_forward_padded(pad_inputs(x, fin_p), pn, pw, block_b=block_b)
    return out[:b, :output_size]


# ----------------------------------------------------------------------------
# Reference + init (pure JAX)
# ----------------------------------------------------------------------------
def init_params(key, input_size, hidden_size, output_size):
    """Deterministic init mimicking torch.nn.Linear's U(-1/sqrt(fan_in), +)."""
    ks = jax.random.split(key, 6)

    def linear(kw, kb, fan_in, fan_out):
        bound = 1.0 / jnp.sqrt(jnp.float32(fan_in))
        w = jax.random.uniform(kw, (fan_out, fan_in), jnp.float32, -bound, bound)
        b = jax.random.uniform(kb, (fan_out,), jnp.float32, -bound, bound)
        return w, b

    w1, b1 = linear(ks[0], ks[1], input_size, hidden_size)
    w2, b2 = linear(ks[2], ks[3], hidden_size, hidden_size)
    w3, b3 = linear(ks[4], ks[5], hidden_size, output_size)
    return {"w1": w1, "b1": b1, "w2": w2, "b2": b2, "w3": w3, "b3": b3}


def reference_forward_f32(x, p):
    h1 = jnp.maximum(x @ p["w1"].T + p["b1"][None, :], 0.0)
    h2 = jnp.maximum(h1 @ p["w2"].T + p["b2"][None, :], 0.0)
    return h2 @ p["w3"].T + p["b3"][None, :]


def reference_forward_bf16(x, p):
    """Mirrors the kernel's numeric scheme: bf16 matmul operands, f32 accum/epilogue."""
    bf, f32 = jnp.bfloat16, jnp.float32

    def lin(a, w, b):
        y = jnp.dot(a.astype(bf), w.T.astype(bf), preferred_element_type=f32)
        return y + b.astype(bf).astype(f32)[None, :]

    h1 = jnp.maximum(lin(x, p["w1"], p["b1"]), 0.0)
    h2 = jnp.maximum(lin(h1, p["w2"], p["b2"]), 0.0)
    return lin(h2, p["w3"], p["b3"])


# ----------------------------------------------------------------------------
if __name__ == "__main__":
    # Shapes consistent with the module: input_size = len(all_words),
    # hidden_size = 8 (fixed in the source), output_size = len(tags).
    batch, input_size, hidden_size, output_size = 8, 32, 8, 6

    key = jax.random.PRNGKey(0)
    kx, kp = jax.random.split(key)
    params = init_params(kp, input_size, hidden_size, output_size)

    pn, pw = pack_params(params, input_size, output_size)   # one-time packing
    fin_p = packed_input_features(pn)

    # --- small batch: gridless hot path -----------------------------------
    x = jax.random.normal(kx, (batch, input_size), dtype=jnp.float32)
    x_p = pad_inputs(x, fin_p)                               # once, upstream

    out_slab = neural_net_forward_padded(x_p, pn, pw)
    out_slab = jax.block_until_ready(out_slab)
    out = out_slab[:batch, :output_size]

    ref_bf16 = reference_forward_bf16(x, params)
    ref_f32 = reference_forward_f32(x, params)
    assert out.shape == (batch, output_size)
    assert jnp.allclose(out, ref_bf16, atol=1e-3, rtol=1e-3)          # matched precision
    assert jnp.allclose(out, ref_f32, atol=5e-2, rtol=5e-2)           # vs f32 module
    # Padded logit lanes hold -1e30 -> argmax on the dense slab is safe as-is.
    assert jnp.array_equal(jnp.argmax(out_slab[:batch], axis=-1),
                           jnp.argmax(out, axis=-1))

    # --- larger batch: parallel grid over row tiles (v7x megacore path) ----
    b2 = 64
    x2 = jax.random.normal(jax.random.PRNGKey(1), (b2, input_size), jnp.float32)
    out2 = neural_net_forward(x2, pn, pw, output_size, block_b=16)
    out2 = jax.block_until_ready(out2)
    ref2 = reference_forward_bf16(x2, params)
    assert jnp.allclose(out2, ref2, atol=1e-3, rtol=1e-3)

    print("KERNEL_OK")
</pallas_src>

<mosaic_0001>
module attributes {stable_mosaic.version = 11 : i64} {
  func.func @_mlp_kernel(%arg0: memref<8x32xf32, #tpu.memory_space<vmem>>, %arg1: memref<80x8xbf16, #tpu.memory_space<vmem>>, %arg2: memref<32x128xbf16, #tpu.memory_space<vmem>>, %arg3: memref<8x128xf32, #tpu.memory_space<vmem>>) attributes {dimension_semantics = [], scalar_prefetch = 0 : i64, scratch_operands = 0 : i64, tpu.core_type = #tpu.core_type<tc>} {
    %c0 = arith.constant 0 : index
    %c0_0 = arith.constant 0 : index
    %0 = vector.load %arg0[%c0, %c0_0] : memref<8x32xf32, #tpu.memory_space<vmem>>, vector<8x32xf32>
    %1 = arith.truncf %0 : vector<8x32xf32> to vector<8x32xbf16>
    %c0_1 = arith.constant 0 : index
    %c0_2 = arith.constant 0 : index
    %2 = vector.load %arg1[%c0_1, %c0_2] : memref<80x8xbf16, #tpu.memory_space<vmem>>, vector<32x8xbf16>
    %cst = arith.constant dense<0.000000e+00> : vector<8x8xf32>
    %3 = tpu.matmul %1, %2, %cst {dimension_numbers = #tpu.dot_dimension_numbers<[1], [0], [0], [1], [0, 0, 1, 1], [], []>} : vector<8x32xbf16>, vector<32x8xbf16>, vector<8x8xf32> -> vector<8x8xf32>
    %c32 = arith.constant 32 : index
    %c0_3 = arith.constant 0 : index
    %4 = vector.load %arg1[%c32, %c0_3] : memref<80x8xbf16, #tpu.memory_space<vmem>>, vector<1x8xbf16>
    %5 = arith.extf %4 : vector<1x8xbf16> to vector<1x8xf32>
    %6 = vector.broadcast %5 : vector<1x8xf32> to vector<8x8xf32>
    %7 = arith.addf %3, %6 : vector<8x8xf32>
    %cst_4 = arith.constant 0.000000e+00 : f32
    %8 = vector.broadcast %cst_4 : f32 to vector<8x8xf32>
    %9 = arith.maximumf %7, %8 : vector<8x8xf32>
    %10 = arith.truncf %9 : vector<8x8xf32> to vector<8x8xbf16>
    %c48 = arith.constant 48 : index
    %c0_5 = arith.constant 0 : index
    %11 = vector.load %arg1[%c48, %c0_5] : memref<80x8xbf16, #tpu.memory_space<vmem>>, vector<8x8xbf16>
    %cst_6 = arith.constant dense<0.000000e+00> : vector<8x8xf32>
    %12 = tpu.matmul %10, %11, %cst_6 {dimension_numbers = #tpu.dot_dimension_numbers<[1], [0], [0], [1], [0, 0, 1, 1], [], []>} : vector<8x8xbf16>, vector<8x8xbf16>, vector<8x8xf32> -> vector<8x8xf32>
    %c64 = arith.constant 64 : index
    %c0_7 = arith.constant 0 : index
    %13 = vector.load %arg1[%c64, %c0_7] : memref<80x8xbf16, #tpu.memory_space<vmem>>, vector<1x8xbf16>
    %14 = arith.extf %13 : vector<1x8xbf16> to vector<1x8xf32>
    %15 = vector.broadcast %14 : vector<1x8xf32> to vector<8x8xf32>
    %16 = arith.addf %12, %15 : vector<8x8xf32>
    %cst_8 = arith.constant 0.000000e+00 : f32
    %17 = vector.broadcast %cst_8 : f32 to vector<8x8xf32>
    %18 = arith.maximumf %16, %17 : vector<8x8xf32>
    %19 = arith.truncf %18 : vector<8x8xf32> to vector<8x8xbf16>
    %c0_9 = arith.constant 0 : index
    %c0_10 = arith.constant 0 : index
    %20 = vector.load %arg2[%c0_9, %c0_10] : memref<32x128xbf16, #tpu.memory_space<vmem>>, vector<8x128xbf16>
    %cst_11 = arith.constant dense<0.000000e+00> : vector<8x128xf32>
    %21 = tpu.matmul %19, %20, %cst_11 {dimension_numbers = #tpu.dot_dimension_numbers<[1], [0], [0], [1], [0, 0, 1, 1], [], []>} : vector<8x8xbf16>, vector<8x128xbf16>, vector<8x128xf32> -> vector<8x128xf32>
    %c16 = arith.constant 16 : index
    %c0_12 = arith.constant 0 : index
    %22 = vector.load %arg2[%c16, %c0_12] : memref<32x128xbf16, #tpu.memory_space<vmem>>, vector<1x128xbf16>
    %23 = arith.extf %22 : vector<1x128xbf16> to vector<1x128xf32>
    %24 = vector.broadcast %23 : vector<1x128xf32> to vector<8x128xf32>
    %25 = arith.addf %21, %24 : vector<8x128xf32>
    %c0_13 = arith.constant 0 : index
    %c0_14 = arith.constant 0 : index
    %26 = vector.load %arg3[%c0_13, %c0_14] : memref<8x128xf32, #tpu.memory_space<vmem>>, vector<8x128xf32>
    tpu.vector_store %arg3[%c0_13, %c0_14], %25 {strides = array<i32>} : memref<8x128xf32, #tpu.memory_space<vmem>>, vector<8x128xf32>,
    return
  }
}

</mosaic_0001>

<bundles_post_ra>
// kernel: tpu_custom_call.1
= control target key start
LH: loop header
LB: loop body
LE: loop exit
PB: predicated region body
PF: predicated region fallthrough
CT: control target
= control target key end

     0   :  { %s211_s0 = inlined_call_operand.vmem [shape: f32[8,32], index: 0, kind: input, shape index: {}]   ;;  %s212_s1 = inlined_call_operand.vmem [shape: bf16[80,8], index: 1, kind: input, shape index: {}]   ;;  %s213_s2 = inlined_call_operand.vmem [shape: bf16[32,128], index: 2, kind: input, shape index: {}]   ;;  %s214_s3 = inlined_call_operand.hbm [shape: f32[8,128], index: 3, kind: output, shape index: {}]  }
   0x1   :  { %v135_v0 = vld [vmem:[%s212_s1 + $0x8] sm:$0xff] }
   0x2   :  { %8 = vsyncpa [#allocation3], 0  ;;  %47 = vmatpush.bf16.msra.mxu0 %v135_v0  ;;  %v134_v1 = vld [vmem:[%s212_s1] sm:$0xff]  ;;  %vm37_vm0 = vcmask 261120   ;;  %v56_v4 = vld [vmem:[%s212_s1 + $0x18] sm:$0xf] }
   0x3   :  { %v16_v2 = vld [vmem:[%s211_s0] sm:$0xff]  ;;  %vm64_vm1 = vcmask 1043456   ;;  %v22_v6 = vld [vmem:[%s212_s1 + $0x10] sm:$0x1]  ;;  %vm60_vm2 = vcmask 64512   ;;  %s163_s27 = smov [#allocation2]  }
   0x4   :  { %v17_v3 = vpack.c.bf16 %v16_v2, %v16_v2  ;;  %v66_v5 = vsel %vm64_vm1, %v56_v4, 0  ;;  %v23_v7 = vunpack.c.l.bf16 %v22_v6  ;;  %v83_v14 = vld [vmem:[%s213_s2] sm:$0xf]  ;;  %v84_v24 = vld [vmem:[%s213_s2 + $0x8] sm:$0x1]  ;;  %s112_s28 = sshll.u32 %s163_s27, 4  ;;  %s113_s28 = int_to_ptr.vmem [resolvable:$true] %s112_s28 }
   0x5   :  { %75 = vmatpush.bf16.msra.mxu1 %v66_v5  ;;  %v91_v15 = vsel %vm64_vm1, %v83_v14, 0  ;;  %v57_v16 = vld [vmem:[%s212_s1 + $0x20] sm:$0x1]  ;;  %v85_v25 = vunpack.c.l.bf16 %v84_v24  ;;  %s114_s1 = sshll.u32 %s214_s3, 4  ;;  %s115_s1 = int_to_ptr.hbm [resolvable:$true] %s114_s1 }
   0x6   :  { %48 = vmatpush.bf16.msra.mxu0 %v134_v1  ;;  %v24_v8 = vperm.slane %v23_v7, 0  ;;  %100 = vmatpush.bf16.msra.mxu2 %v91_v15  ;;  %v58_v17 = vunpack.c.l.bf16 %v57_v16 }
   0x7   :  { %v86_v26 = vperm.slane %v85_v25, 0 }
   0x8   :  { %v59_v18 = vperm.slane %v58_v17, 0 }
   0x9   :  { %131 = vmatmul.msk.bf16.vlgmr.msra.gmra.mxu0 %vm37_vm0, %v17_v3 }
  0x86   :  { %v50_v9 = vpop.f32.mrf.mxu0 }
  0x87   :  { %v51_v10 = vadd.f32 %v50_v9, %v24_v8 }
  0x89   :  { %v54_v11 = vmax.f32 %v51_v10, 0.0 }
  0x8b   :  { %v55_v12 = vpack.c.bf16 %v54_v11, %v54_v11 }
  0x8d   :  { %132 = vmatmul.msk.bf16.vlgmr.msra.gmra.mxu1 %vm60_vm2, %v55_v12 }
  0x8e   :  { %v52_v13 = vpop.f32.mrf.mxu0 }
 0x10a   :  { %v77_v19 = vpop.f32.mrf.mxu1 }
 0x10b   :  { %v78_v20 = vadd.f32 %v77_v19, %v59_v18 }
 0x10d   :  { %v81_v21 = vmax.f32 %v78_v20, 0.0 }
 0x10f   :  { %v82_v22 = vpack.c.bf16 %v81_v21, %v81_v21 }
 0x111   :  { %133 = vmatmul.msk.bf16.vlgmr.msra.gmra.mxu2 %vm60_vm2, %v82_v22 }
 0x112   :  { %v79_v23 = vpop.f32.mrf.mxu1 }
 0x194   :  { %v102_v27 = vpop.f32.mrf.mxu2 }
 0x195   :  { %v103_v28 = vadd.f32 %v102_v27, %v86_v26 }
 0x197   :  { %106 = vst [vmem:[#allocation2] sm:$0xff] %v103_v28 }
 0x198   :  { %117 = dma.vmem_to_hbm [thread:$0]  %s113_s28, 128, %s115_s1, [#allocation3]  }
 0x19c   :  { %v104_v29 = vpop.f32.mrf.mxu2 }
 0x19d   :  { %161 = dma.done.wait [#allocation3], 128  }
 0x19e   :  { %162 = vsyncadd [#allocation3], 4294967168 }
 0x19f   :  { %122 = vsyncpa [#allocation3], 1 }

</bundles_post_ra>
